<compile_context>
chip_gen: v6e
topology: v6e:2x2x1
jax: 0.10.0
libtpu: 0.0.40
codegen_flags: <defaults>
</compile_context>

<pallas_src>
import jax
import jax.numpy as jnp
from jax.experimental import pallas as pl
from jax.experimental.pallas import tpu as pltpu


def _round_up(x, m):
    return ((x + m - 1) // m) * m


def chess_ai_kernel(board_ref, move_ref, w1b_ref, w1m_ref, b1_ref,
                    w2_ref, b2_ref, w3_ref, b3_ref, o_ref):
    # board: (TB, 64)  move: (TB, 4)
    # w1b: (64,128) w1m: (4,128) b1: (1,128)
    # w2: (128,64)  b2: (1,64)   w3: (64,1) b3: (1,1)   o: (TB,1)
    h1 = (jnp.dot(board_ref[...], w1b_ref[...], preferred_element_type=jnp.float32)
          + jnp.dot(move_ref[...], w1m_ref[...], preferred_element_type=jnp.float32)
          + b1_ref[...])
    h1 = jnp.maximum(h1, 0.0)

    h2 = jnp.dot(h1, w2_ref[...], preferred_element_type=jnp.float32) + b2_ref[...]
    h2 = jnp.maximum(h2, 0.0)

    out = jnp.dot(h2, w3_ref[...], preferred_element_type=jnp.float32) + b3_ref[...]
    # TODO(synk): (TB,1) output uses a masked (lane-sparse) store; output bytes
    # are ~1/68 of input bytes so it is not worth a transpose here.
    o_ref[...] = out.astype(o_ref.dtype)


def chess_ai_forward(board, move, params, *, block_b=1024):
    """board: (B, 64) f32, move: (B, 4) f32 -> (B, 1) f32."""
    w1b, w1m, b1, w2, b2, w3, b3 = params
    B = board.shape[0]

    # Batch tile: multiple of 8 (sublane), capped at block_b; pad B up to a
    # whole number of tiles so the last grid step never goes out of bounds.
    tb = min(block_b, _round_up(B, 8))
    b_pad = _round_up(B, tb)
    if b_pad != B:
        board = jnp.pad(board, ((0, b_pad - B), (0, 0)))
        move = jnp.pad(move, ((0, b_pad - B), (0, 0)))

    grid = (b_pad // tb,)

    batch_map = lambda i: (i, 0)      # batch-tiled operands
    const_map = lambda i: (0, 0)      # weights/biases: VMEM-resident across steps

    out = pl.pallas_call(
        chess_ai_kernel,
        out_shape=jax.ShapeDtypeStruct((b_pad, 1), jnp.float32),
        grid=grid,
        in_specs=[
            pl.BlockSpec((tb, 64), batch_map),    # board tile
            pl.BlockSpec((tb, 4), batch_map),     # move tile
            pl.BlockSpec((64, 128), const_map),   # w1 (board part)
            pl.BlockSpec((4, 128), const_map),    # w1 (move part)
            pl.BlockSpec((1, 128), const_map),    # b1
            pl.BlockSpec((128, 64), const_map),   # w2
            pl.BlockSpec((1, 64), const_map),     # b2
            pl.BlockSpec((64, 1), const_map),     # w3
            pl.BlockSpec((1, 1), const_map),      # b3
        ],
        out_specs=pl.BlockSpec((tb, 1), batch_map),
        compiler_params=pltpu.CompilerParams(
            dimension_semantics=("parallel",),    # megacore sharding on v7x
        ),
    )(board, move, w1b, w1m, b1, w2, b2, w3, b3)

    return out[:B]


def init_params(key):
    """Deterministic init mimicking PyTorch nn.Linear default (uniform +-1/sqrt(fan_in)).
    Weights are stored as (in_features, out_features); fc1's weight is pre-split
    into a board part (64,128) and a move part (4,128)."""
    def linear(key, fan_in, fan_out):
        kw, kb = jax.random.split(key)
        bound = 1.0 / jnp.sqrt(jnp.float32(fan_in))
        w = jax.random.uniform(kw, (fan_in, fan_out), jnp.float32, -bound, bound)
        b = jax.random.uniform(kb, (1, fan_out), jnp.float32, -bound, bound)
        return w, b

    k1, k2, k3 = jax.random.split(key, 3)
    w1, b1 = linear(k1, 64 + 4, 128)
    w2, b2 = linear(k2, 128, 64)
    w3, b3 = linear(k3, 64, 1)
    w1b, w1m = w1[:64], w1[64:]
    return (w1b, w1m, b1, w2, b2, w3, b3)


def reference_forward(board, move, params):
    w1b, w1m, b1, w2, b2, w3, b3 = params
    h1 = jnp.maximum(board @ w1b + move @ w1m + b1, 0.0)
    h2 = jnp.maximum(h1 @ w2 + b2, 0.0)
    return h2 @ w3 + b3


if __name__ == "__main__":
    key = jax.random.PRNGKey(0)
    k_params, k_board, k_move = jax.random.split(key, 3)

    params = init_params(k_params)

    B = 2
    board = jax.random.normal(k_board, (B, 64), jnp.float32)
    move = jax.random.normal(k_move, (B, 4), jnp.float32)

    out = chess_ai_forward(board, move, params)
    out = jax.block_until_ready(out)

    ref = reference_forward(board, move, params)
    assert out.shape == (B, 1), out.shape
    assert jnp.allclose(out, ref, atol=1e-5, rtol=1e-5), (out, ref)

    # Also exercise a multi-tile, non-divisible batch to validate the grid path.
    B2 = 2500
    kb2, km2 = jax.random.split(jax.random.PRNGKey(1))
    board2 = jax.random.normal(kb2, (B2, 64), jnp.float32)
    move2 = jax.random.normal(km2, (B2, 4), jnp.float32)
    out2 = jax.block_until_ready(chess_ai_forward(board2, move2, params))
    ref2 = reference_forward(board2, move2, params)
    assert out2.shape == (B2, 1), out2.shape
    assert jnp.allclose(out2, ref2, atol=1e-4, rtol=1e-4)

    print("KERNEL_OK")
</pallas_src>

<mosaic_0001>
module attributes {stable_mosaic.version = 11 : i64} {
  func.func @chess_ai_kernel(%arg0: i32, %arg1: memref<8x64xf32, #tpu.memory_space<vmem>>, %arg2: memref<8x4xf32, #tpu.memory_space<vmem>>, %arg3: memref<64x128xf32, #tpu.memory_space<vmem>>, %arg4: memref<4x128xf32, #tpu.memory_space<vmem>>, %arg5: memref<1x128xf32, #tpu.memory_space<vmem>>, %arg6: memref<128x64xf32, #tpu.memory_space<vmem>>, %arg7: memref<1x64xf32, #tpu.memory_space<vmem>>, %arg8: memref<64x1xf32, #tpu.memory_space<vmem>>, %arg9: memref<1x1xf32, #tpu.memory_space<vmem>>, %arg10: memref<8x1xf32, #tpu.memory_space<vmem>>) attributes {dimension_semantics = [#tpu.dimension_semantics<parallel>], iteration_bounds = array<i64: 1>, scalar_prefetch = 0 : i64, scratch_operands = 0 : i64, tpu.core_type = #tpu.core_type<tc>, window_params = [{transform_indices = @transform_0, window_bounds = array<i64: 8, 64>}, {transform_indices = @transform_1, window_bounds = array<i64: 8, 4>}, {pipeline_mode = #tpu.pipeline_mode<synchronous>, transform_indices = @transform_2, window_bounds = array<i64: 64, 128>}, {pipeline_mode = #tpu.pipeline_mode<synchronous>, transform_indices = @transform_3, window_bounds = array<i64: 4, 128>}, {pipeline_mode = #tpu.pipeline_mode<synchronous>, transform_indices = @transform_4, window_bounds = array<i64: 1, 128>}, {pipeline_mode = #tpu.pipeline_mode<synchronous>, transform_indices = @transform_5, window_bounds = array<i64: 128, 64>}, {pipeline_mode = #tpu.pipeline_mode<synchronous>, transform_indices = @transform_6, window_bounds = array<i64: 1, 64>}, {pipeline_mode = #tpu.pipeline_mode<synchronous>, transform_indices = @transform_7, window_bounds = array<i64: 64, 1>}, {pipeline_mode = #tpu.pipeline_mode<synchronous>, transform_indices = @transform_8, window_bounds = array<i64: 1, 1>}, {transform_indices = @transform_9, window_bounds = array<i64: 8, 1>}]} {
    %c0 = arith.constant 0 : index
    %c0_0 = arith.constant 0 : index
    %0 = vector.load %arg1[%c0, %c0_0] : memref<8x64xf32, #tpu.memory_space<vmem>>, vector<8x64xf32>
    %c0_1 = arith.constant 0 : index
    %c0_2 = arith.constant 0 : index
    %1 = vector.load %arg3[%c0_1, %c0_2] : memref<64x128xf32, #tpu.memory_space<vmem>>, vector<64x128xf32>
    %cst = arith.constant dense<0.000000e+00> : vector<8x128xf32>
    %2 = tpu.matmul %0, %1, %cst {dimension_numbers = #tpu.dot_dimension_numbers<[1], [0], [0], [1], [0, 0, 1, 1], [], []>} : vector<8x64xf32>, vector<64x128xf32>, vector<8x128xf32> -> vector<8x128xf32>
    %c0_3 = arith.constant 0 : index
    %c0_4 = arith.constant 0 : index
    %3 = vector.load %arg2[%c0_3, %c0_4] : memref<8x4xf32, #tpu.memory_space<vmem>>, vector<8x4xf32>
    %c0_5 = arith.constant 0 : index
    %c0_6 = arith.constant 0 : index
    %4 = vector.load %arg4[%c0_5, %c0_6] : memref<4x128xf32, #tpu.memory_space<vmem>>, vector<4x128xf32>
    %cst_7 = arith.constant dense<0.000000e+00> : vector<8x128xf32>
    %5 = tpu.matmul %3, %4, %cst_7 {dimension_numbers = #tpu.dot_dimension_numbers<[1], [0], [0], [1], [0, 0, 1, 1], [], []>} : vector<8x4xf32>, vector<4x128xf32>, vector<8x128xf32> -> vector<8x128xf32>
    %6 = arith.addf %2, %5 : vector<8x128xf32>
    %c0_8 = arith.constant 0 : index
    %c0_9 = arith.constant 0 : index
    %7 = vector.load %arg5[%c0_8, %c0_9] : memref<1x128xf32, #tpu.memory_space<vmem>>, vector<1x128xf32>
    %8 = vector.broadcast %7 : vector<1x128xf32> to vector<8x128xf32>
    %9 = arith.addf %6, %8 : vector<8x128xf32>
    %cst_10 = arith.constant 0.000000e+00 : f32
    %10 = vector.broadcast %cst_10 : f32 to vector<8x128xf32>
    %11 = arith.maximumf %9, %10 : vector<8x128xf32>
    %c0_11 = arith.constant 0 : index
    %c0_12 = arith.constant 0 : index
    %12 = vector.load %arg6[%c0_11, %c0_12] : memref<128x64xf32, #tpu.memory_space<vmem>>, vector<128x64xf32>
    %cst_13 = arith.constant dense<0.000000e+00> : vector<8x64xf32>
    %13 = tpu.matmul %11, %12, %cst_13 {dimension_numbers = #tpu.dot_dimension_numbers<[1], [0], [0], [1], [0, 0, 1, 1], [], []>} : vector<8x128xf32>, vector<128x64xf32>, vector<8x64xf32> -> vector<8x64xf32>
    %c0_14 = arith.constant 0 : index
    %c0_15 = arith.constant 0 : index
    %14 = vector.load %arg7[%c0_14, %c0_15] : memref<1x64xf32, #tpu.memory_space<vmem>>, vector<1x64xf32>
    %15 = vector.broadcast %14 : vector<1x64xf32> to vector<8x64xf32>
    %16 = arith.addf %13, %15 : vector<8x64xf32>
    %cst_16 = arith.constant 0.000000e+00 : f32
    %17 = vector.broadcast %cst_16 : f32 to vector<8x64xf32>
    %18 = arith.maximumf %16, %17 : vector<8x64xf32>
    %c0_17 = arith.constant 0 : index
    %c0_18 = arith.constant 0 : index
    %19 = vector.load %arg8[%c0_17, %c0_18] : memref<64x1xf32, #tpu.memory_space<vmem>>, vector<64x1xf32>
    %cst_19 = arith.constant dense<0.000000e+00> : vector<8x1xf32>
    %20 = tpu.matmul %18, %19, %cst_19 {dimension_numbers = #tpu.dot_dimension_numbers<[1], [0], [0], [1], [0, 0, 1, 1], [], []>} : vector<8x64xf32>, vector<64x1xf32>, vector<8x1xf32> -> vector<8x1xf32>
    %c0_20 = arith.constant 0 : index
    %c0_21 = arith.constant 0 : index
    %21 = vector.load %arg9[%c0_20, %c0_21] : memref<1x1xf32, #tpu.memory_space<vmem>>, vector<1x1xf32>
    %22 = vector.broadcast %21 : vector<1x1xf32> to vector<8x1xf32>
    %23 = arith.addf %20, %22 : vector<8x1xf32>
    %c0_22 = arith.constant 0 : index
    %c0_23 = arith.constant 0 : index
    %24 = vector.load %arg10[%c0_22, %c0_23] : memref<8x1xf32, #tpu.memory_space<vmem>>, vector<8x1xf32>
    tpu.vector_store %arg10[%c0_22, %c0_23], %23 {strides = array<i32>} : memref<8x1xf32, #tpu.memory_space<vmem>>, vector<8x1xf32>,
    return
  }
  func.func @transform_0(%arg0: i32) -> (i32, i32) {
    %c0_i32 = arith.constant 0 : i32
    %c0_i32_0 = arith.constant 0 : i32
    return %arg0, %c0_i32 : i32, i32
  }
  func.func @transform_1(%arg0: i32) -> (i32, i32) {
    %c0_i32 = arith.constant 0 : i32
    %c0_i32_0 = arith.constant 0 : i32
    return %arg0, %c0_i32 : i32, i32
  }
  func.func @transform_2(%arg0: i32) -> (i32, i32) {
    %c0_i32 = arith.constant 0 : i32
    %c0_i32_0 = arith.constant 0 : i32
    %c0_i32_1 = arith.constant 0 : i32
    return %c0_i32, %c0_i32_0 : i32, i32
  }
  func.func @transform_3(%arg0: i32) -> (i32, i32) {
    %c0_i32 = arith.constant 0 : i32
    %c0_i32_0 = arith.constant 0 : i32
    %c0_i32_1 = arith.constant 0 : i32
    return %c0_i32, %c0_i32_0 : i32, i32
  }
  func.func @transform_4(%arg0: i32) -> (i32, i32) {
    %c0_i32 = arith.constant 0 : i32
    %c0_i32_0 = arith.constant 0 : i32
    %c0_i32_1 = arith.constant 0 : i32
    return %c0_i32, %c0_i32_0 : i32, i32
  }
  func.func @transform_5(%arg0: i32) -> (i32, i32) {
    %c0_i32 = arith.constant 0 : i32
    %c0_i32_0 = arith.constant 0 : i32
    %c0_i32_1 = arith.constant 0 : i32
    return %c0_i32, %c0_i32_0 : i32, i32
  }
  func.func @transform_6(%arg0: i32) -> (i32, i32) {
    %c0_i32 = arith.constant 0 : i32
    %c0_i32_0 = arith.constant 0 : i32
    %c0_i32_1 = arith.constant 0 : i32
    return %c0_i32, %c0_i32_0 : i32, i32
  }
  func.func @transform_7(%arg0: i32) -> (i32, i32) {
    %c0_i32 = arith.constant 0 : i32
    %c0_i32_0 = arith.constant 0 : i32
    %c0_i32_1 = arith.constant 0 : i32
    return %c0_i32, %c0_i32_0 : i32, i32
  }
  func.func @transform_8(%arg0: i32) -> (i32, i32) {
    %c0_i32 = arith.constant 0 : i32
    %c0_i32_0 = arith.constant 0 : i32
    %c0_i32_1 = arith.constant 0 : i32
    return %c0_i32, %c0_i32_0 : i32, i32
  }
  func.func @transform_9(%arg0: i32) -> (i32, i32) {
    %c0_i32 = arith.constant 0 : i32
    %c0_i32_0 = arith.constant 0 : i32
    return %arg0, %c0_i32 : i32, i32
  }
}

</mosaic_0001>

<bundles_post_ra>
// kernel: tpu_custom_call.1
= control target key start
LH: loop header
LB: loop body
LE: loop exit
PB: predicated region body
PF: predicated region fallthrough
CT: control target
= control target key end

     0   :  { %v518_v0 = vmov 0.0   ;;  %vm49_vm0 = vcmask 1043456   ;;  %vm519_vm1 = vmmov 0   ;;  %vm45_vm2 = vcmask 31744   ;;  %s730_s2 = inlined_call_operand.vmem [shape: f32[64,128], index: 2, kind: input, shape index: {}]   ;;  %s731_s3 = inlined_call_operand.vmem [shape: f32[4,128], index: 3, kind: input, shape index: {}]   ;;  %s732_s1 = inlined_call_operand.vmem [shape: f32[8,4], index: 1, kind: input, shape index: {}]   ;;  %s733_s5 = inlined_call_operand.vmem [shape: f32[128,64], index: 5, kind: input, shape index: {}]   ;;  %s734_s0 = inlined_call_operand.vmem [shape: f32[8,64], index: 0, kind: input, shape index: {}]   ;;  %s735_s7 = inlined_call_operand.vmem [shape: f32[64,1], index: 7, kind: input, shape index: {}]   ;;  %s736_s4 = inlined_call_operand.vmem [shape: f32[1,128], index: 4, kind: input, shape index: {}]   ;;  %s737_s8 = inlined_call_operand.<no memory space> [shape: f32[1,1], index: 8, kind: input, shape index: {}]   ;;  %s738_s6 = inlined_call_operand.vmem [shape: f32[1,64], index: 6, kind: input, shape index: {}]   ;;  %s739_s9 = inlined_call_operand.vmem [shape: f32[8,1], index: 9, kind: output, shape index: {}]  }
   0x1   :  { %443 = vmatprep.subr.mxu1 %v518_v0  ;;  %v42_v1 = vld [vmem:[%s730_s2 + $0x38] sm:$0xff]  ;;  %v41_v2 = vld [vmem:[%s730_s2 + $0x30] sm:$0xff]  ;;  %438 = vmatprep.subr.mxu0 %v518_v0  ;;  %v40_v3 = vld [vmem:[%s730_s2 + $0x28] sm:$0xff]  ;;  %vm123_vm3 = vcmask 523264   ;;  %v14_v44 = vstv %s737_s8  ;;  %vm388_vm4 = vcmask 7168  }
   0x2   :  { %444 = vmatpush3.msra.mxu1 %v42_v1  ;;  %440 = vmatprep.mubr.msk.f32.mxu0 %vm519_vm1, %v518_v0  ;;  %v44_v4 = vld [vmem:[%s731_s3] sm:$0xf]  ;;  %v221_v6 = vld [vmem:[%s733_s5 + $0x78] sm:$0xff]  ;;  %v220_v8 = vld [vmem:[%s733_s5 + $0x70] sm:$0xff]  ;;  %15 = vst [vmem:[#allocation2] sm:$0x1] %v14_v44 }
   0x3   :  { %445 = vmatprep.subr.mxu1 %v518_v0  ;;  %v43_v5 = vld [vmem:[%s732_s1] sm:$0xff]  ;;  %459 = vmatprep.mubr.msk.f32.mxu1 %vm519_vm1, %v518_v0  ;;  %v38_v9 = vld [vmem:[%s730_s2 + $0x18] sm:$0xff]  ;;  %v219_v10 = vld [vmem:[%s733_s5 + $0x68] sm:$0xff] }
   0x4   :  { %446 = vmatpush3.msra.mxu1 %v41_v2  ;;  %439 = vmatpush3.msk.msra.mxu0 %vm49_vm0, %v44_v4  ;;  %v39_v7 = vld [vmem:[%s730_s2 + $0x20] sm:$0xff]  ;;  %v37_v11 = vld [vmem:[%s730_s2 + $0x10] sm:$0xff]  ;;  %v36_v13 = vld [vmem:[%s730_s2 + $0x8] sm:$0xff] }
   0x5   :  { %447 = vmatprep.subr.mxu1 %v518_v0  ;;  %441 = vmatmul.mubr.msk.f32.vlgmr.msra.gmra.mxu0 %vm45_vm2, %v43_v5  ;;  %v218_v12 = vld [vmem:[%s733_s5 + $0x60] sm:$0xff]  ;;  %v217_v14 = vld [vmem:[%s733_s5 + $0x58] sm:$0xff]  ;;  %v216_v17 = vld [vmem:[%s733_s5 + $0x50] sm:$0xff] }
   0x6   :  { %448 = vmatpush3.msra.mxu1 %v40_v3  ;;  %462 = vmatprep.subr.mxu0 %v518_v0  ;;  %v35_v15 = vld [vmem:[%s730_s2] sm:$0xff]  ;;  %v215_v18 = vld [vmem:[%s733_s5 + $0x48] sm:$0xff]  ;;  %v213_v20 = vld [vmem:[%s733_s5 + $0x38] sm:$0xff] }
   0x7   :  { %449 = vmatprep.subr.mxu1 %v518_v0  ;;  %463 = vmatpush3.msra.mxu0 %v221_v6  ;;  %v34_v16 = vld [vmem:[%s734_s0] sm:$0xff]  ;;  %v212_v21 = vld [vmem:[%s733_s5 + $0x30] sm:$0xff]  ;;  %v211_v22 = vld [vmem:[%s733_s5 + $0x28] sm:$0xff] }
   0x8   :  { %450 = vmatpush3.msra.mxu1 %v39_v7  ;;  %464 = vmatprep.subr.mxu0 %v518_v0  ;;  %v214_v19 = vld [vmem:[%s733_s5 + $0x40] sm:$0xff]  ;;  %v209_v24 = vld [vmem:[%s733_s5 + $0x18] sm:$0xff]  ;;  %v208_v25 = vld [vmem:[%s733_s5 + $0x10] sm:$0xff] }
   0x9   :  { %451 = vmatprep.subr.mxu1 %v518_v0  ;;  %465 = vmatpush3.msra.mxu0 %v220_v8  ;;  %v210_v23 = vld [vmem:[%s733_s5 + $0x20] sm:$0xff]  ;;  %v207_v26 = vld [vmem:[%s733_s5 + $0x8] sm:$0xff]  ;;  %v307_v28 = vld [vmem:[%s735_s7 + $0x38] sm:$0xff] }
   0xa   :  { %452 = vmatpush3.msra.mxu1 %v38_v9  ;;  %466 = vmatprep.subr.mxu0 %v518_v0  ;;  %v206_v27 = vld [vmem:[%s733_s5] sm:$0xff]  ;;  %v306_v29 = vld [vmem:[%s735_s7 + $0x30] sm:$0xff]  ;;  %v305_v30 = vld [vmem:[%s735_s7 + $0x28] sm:$0xff] }
   0xb   :  { %453 = vmatprep.subr.mxu1 %v518_v0  ;;  %467 = vmatpush3.msra.mxu0 %v219_v10  ;;  %v304_v31 = vld [vmem:[%s735_s7 + $0x20] sm:$0xff]  ;;  %v303_v32 = vld [vmem:[%s735_s7 + $0x18] sm:$0xff]  ;;  %v302_v41 = vld [vmem:[%s735_s7 + $0x10] sm:$0xff] }
   0xc   :  { %454 = vmatpush3.msra.mxu1 %v37_v11  ;;  %468 = vmatprep.subr.mxu0 %v518_v0  ;;  %v397_v36 = vld [vmem:[%s736_s4] ss:$0 sm:$0xff]  ;;  %v301_v42 = vld [vmem:[%s735_s7 + $0x8] sm:$0xff] }
   0xd   :  { %455 = vmatprep.subr.mxu1 %v518_v0  ;;  %469 = vmatpush3.msra.mxu0 %v218_v12  ;;  %v300_v43 = vld [vmem:[%s735_s7] sm:$0xff] }
   0xe   :  { %456 = vmatpush3.msra.mxu1 %v36_v13  ;;  %470 = vmatprep.subr.mxu0 %v518_v0  ;;  %v398_v45 = vld [vmem:[%s738_s6] ss:$0 sm:$0xff] }
   0xf   :  { %457 = vmatprep.subr.mxu1 %v518_v0  ;;  %471 = vmatpush3.msra.mxu0 %v217_v14  ;;  %v399_v50 = vld [vmem:[#allocation2] ss:$0 sm:$0xff] }
  0x10   :  { %458 = vmatpush3.msra.mxu1 %v35_v15  ;;  %472 = vmatprep.subr.mxu0 %v518_v0 }
  0x11   :  { %460 = vmatmul.mubr.msk.f32.vlgmr.msra.gmra.mxu1 %vm123_vm3, %v34_v16  ;;  %473 = vmatpush3.msra.mxu0 %v216_v17 }
  0x12   :  { %474 = vmatprep.subr.mxu0 %v518_v0  ;;  %494 = vmatprep.mubr.msk.f32.mxu0 %vm519_vm1, %v518_v0 }
  0x13   :  { %475 = vmatpush3.msra.mxu0 %v215_v18  ;;  %497 = vmatprep.subr.mxu1 %v518_v0 }
  0x14   :  { %476 = vmatprep.subr.mxu0 %v518_v0  ;;  %513 = vmatprep.mubr.msk.f32.mxu1 %vm519_vm1, %v518_v0 }
  0x15   :  { %477 = vmatpush3.msra.mxu0 %v214_v19  ;;  %498 = vmatpush3.msra.mxu1 %v307_v28 }
  0x16   :  { %478 = vmatprep.subr.mxu0 %v518_v0  ;;  %499 = vmatprep.subr.mxu1 %v518_v0 }
  0x17   :  { %479 = vmatpush3.msra.mxu0 %v213_v20  ;;  %500 = vmatpush3.msra.mxu1 %v306_v29 }
  0x18   :  { %480 = vmatprep.subr.mxu0 %v518_v0  ;;  %501 = vmatprep.subr.mxu1 %v518_v0 }
  0x19   :  { %481 = vmatpush3.msra.mxu0 %v212_v21  ;;  %502 = vmatpush3.msra.mxu1 %v305_v30 }
  0x1a   :  { %482 = vmatprep.subr.mxu0 %v518_v0  ;;  %503 = vmatprep.subr.mxu1 %v518_v0 }
  0x1b   :  { %483 = vmatpush3.msra.mxu0 %v211_v22  ;;  %504 = vmatpush3.msra.mxu1 %v304_v31 }
  0x1c   :  { %484 = vmatprep.subr.mxu0 %v518_v0  ;;  %505 = vmatprep.subr.mxu1 %v518_v0 }
  0x1d   :  { %485 = vmatpush3.msra.mxu0 %v210_v23  ;;  %506 = vmatpush3.msra.mxu1 %v303_v32 }
  0x1e   :  { %486 = vmatprep.subr.mxu0 %v518_v0  ;;  %507 = vmatprep.subr.mxu1 %v518_v0 }
  0x1f   :  { %487 = vmatpush3.msra.mxu0 %v209_v24  ;;  %508 = vmatpush3.msra.mxu1 %v302_v41 }
  0x20   :  { %488 = vmatprep.subr.mxu0 %v518_v0  ;;  %509 = vmatprep.subr.mxu1 %v518_v0 }
  0x21   :  { %489 = vmatpush3.msra.mxu0 %v208_v25  ;;  %510 = vmatpush3.msra.mxu1 %v301_v42 }
  0x22   :  { %490 = vmatprep.subr.mxu0 %v518_v0  ;;  %511 = vmatprep.subr.mxu1 %v518_v0 }
  0x23   :  { %491 = vmatpush3.msra.mxu0 %v207_v26  ;;  %512 = vmatpush3.msra.mxu1 %v300_v43 }
  0x24   :  { %492 = vmatprep.subr.mxu0 %v518_v0 }
  0x25   :  { %493 = vmatpush3.msra.mxu0 %v206_v27 }
  0xc5   :  { %v119_v33 = vpop.f32.mrf.mxu0 }
  0xc7   :  { %v442_v34 = vpop.f32.mrf.mxu0 }
  0xd1   :  { %v193_v35 = vpop.f32.mrf.mxu1 }
  0xd2   :  { %v194_v37 = vadd.f32 %v193_v35, %v119_v33 }
  0xd3   :  { %v461_v38 = vpop.f32.mrf.mxu1 }
  0xd4   :  { %v204_v39 = vadd.f32 %v397_v36, %v194_v37 }
  0xd6   :  { %v205_v40 = vmax.f32 %v204_v39, 0.0 }
  0xd8   :  { %495 = vmatmul.mubr.f32.vlgmr.msra.gmra.mxu0 %v205_v40 }
 0x198   :  { %v295_v46 = vpop.f32.mrf.mxu0 }
 0x199   :  { %v296_v47 = vadd.f32 %v398_v45, %v295_v46 }
 0x19a   :  { %v496_v48 = vpop.f32.mrf.mxu0 }
 0x19b   :  { %v299_v49 = vmax.f32 %v296_v47, 0.0 }
 0x19d   :  { %514 = vmatmul.mubr.msk.f32.vlgmr.msra.gmra.mxu1 %vm123_vm3, %v299_v49 }
 0x25d   :  { %v384_v51 = vpop.f32.mrf.mxu1 }
 0x25e   :  { %v385_v52 = vadd.f32 %v399_v50, %v384_v51 }
 0x25f   :  { %v515_v53 = vpop.f32.mrf.mxu1 }
 0x260   :  { %389 = vst.msk [vmem:[%s739_s9] sm:$0xff] %vm388_vm4, %v385_v52 }

</bundles_post_ra>
